<compile_context>
chip_gen: v6e
topology: v6e:2x2x1
jax: 0.10.0
libtpu: 0.0.40
codegen_flags: <defaults>
</compile_context>

<pallas_src>
import jax
import jax.numpy as jnp
from jax.experimental import pallas as pl
from jax.experimental.pallas import tpu as pltpu


def _round_up(x, m):
    return ((x + m - 1) // m) * m


def _make_mlp_kernel(n_layers, fused_gather):
    """Kernel: (indices|embeddings) -> n_layers x (Linear + ReLU), lane-dense."""

    def kernel(*refs):
        if fused_gather:
            if n_layers > 1:
                (uidx_ref, iidx_ref, utbl_ref, itbl_ref,
                 w0u_ref, w0i_ref, wrest_ref, b_ref, out_ref) = refs
            else:
                (uidx_ref, iidx_ref, utbl_ref, itbl_ref,
                 w0u_ref, w0i_ref, b_ref, out_ref) = refs
                wrest_ref = None

            tm = uidx_ref.shape[0]
            nu = utbl_ref.shape[0]
            ni = itbl_ref.shape[0]
            # Exact one-hot gather on the MXU (tables are small & VMEM-resident
            # on this path).  Padded batch rows read table row 0 (harmless).
            u_onehot = (jax.lax.broadcasted_iota(jnp.int32, (tm, nu), 1)
                        == uidx_ref[...]).astype(jnp.bfloat16)
            i_onehot = (jax.lax.broadcasted_iota(jnp.int32, (tm, ni), 1)
                        == iidx_ref[...]).astype(jnp.bfloat16)
            ue = jnp.dot(u_onehot, utbl_ref[...],
                         preferred_element_type=jnp.float32).astype(jnp.bfloat16)
            ie = jnp.dot(i_onehot, itbl_ref[...],
                         preferred_element_type=jnp.float32).astype(jnp.bfloat16)
        else:
            if n_layers > 1:
                ue_ref, ie_ref, w0u_ref, w0i_ref, wrest_ref, b_ref, out_ref = refs
            else:
                ue_ref, ie_ref, w0u_ref, w0i_ref, b_ref, out_ref = refs
                wrest_ref = None
            ue = ue_ref[...]
            ie = ie_ref[...]

        b_all = b_ref[...]  # [n_layers, PAD] f32

        # Layer 0: concat(ue, ie) @ W0  ==  ue @ W0[:D] + ie @ W0[D:]
        acc = jnp.dot(ue, w0u_ref[...], preferred_element_type=jnp.float32)
        acc = acc + jnp.dot(ie, w0i_ref[...], preferred_element_type=jnp.float32)
        # f32 bias + ReLU epilogue (portable incl. v5e), then one bf16 cast:
        # the bf16 value is both the next matmul operand and the stored output.
        x = jnp.maximum(acc + b_all[0:1, :], 0.0).astype(jnp.bfloat16)

        for li in range(1, n_layers):
            acc = jnp.dot(x, wrest_ref[li - 1],
                          preferred_element_type=jnp.float32)
            x = jnp.maximum(acc + b_all[li:li + 1, :], 0.0).astype(jnp.bfloat16)

        out_ref[...] = x  # lane-dense [TM, PAD] bf16 store

    return kernel


def pack_params(user_table, item_table, weights, biases, *,
                fuse_gather_max_rows=2048):
    """One-time parameter packing (hoisted out of the per-call path)."""
    n_layers = len(weights)
    D = user_table.shape[1]
    assert item_table.shape[1] == D, "user/item latent dims must match"
    assert weights[0].shape[0] == 2 * D, "layer 0 expects concat(user,item)"
    widths = [w.shape[1] for w in weights]
    for li in range(1, n_layers):
        assert weights[li].shape[0] == widths[li - 1], \
            "layer widths must chain (in_f == previous out_f)"

    # Lane width covers the widest layer output (correctness-concern fix).
    PAD = max(128, _round_up(max(widths), 128))

    # Split + zero-pad the first weight: [2D, out0] -> two [D, PAD] bf16 blocks.
    out0 = widths[0]
    w0 = weights[0].astype(jnp.bfloat16)
    w0u = jnp.zeros((D, PAD), jnp.bfloat16).at[:, :out0].set(w0[:D])
    w0i = jnp.zeros((D, PAD), jnp.bfloat16).at[:, :out0].set(w0[D:])

    # Remaining weights zero-padded to [PAD, PAD] and stacked.
    wrest = None
    if n_layers > 1:
        blocks = []
        for w in weights[1:]:
            in_f, out_f = w.shape
            blk = jnp.zeros((PAD, PAD), jnp.bfloat16)
            blk = blk.at[:in_f, :out_f].set(w.astype(jnp.bfloat16))
            blocks.append(blk)
        wrest = jnp.stack(blocks, axis=0)  # [n_layers-1, PAD, PAD]

    # Biases packed into one lane-padded f32 buffer.
    b_pack = jnp.zeros((n_layers, PAD), jnp.float32)
    for li, b in enumerate(biases):
        b_pack = b_pack.at[li, :b.shape[0]].set(b.astype(jnp.float32))

    fused = (user_table.shape[0] <= fuse_gather_max_rows
             and item_table.shape[0] <= fuse_gather_max_rows)
    if fused:
        # Tables kept VMEM-resident inside the kernel: pre-cast to bf16 and
        # zero-pad rows to a 128 multiple (padded rows are never selected).
        nu_pad = _round_up(user_table.shape[0], 128)
        ni_pad = _round_up(item_table.shape[0], 128)
        utbl = jnp.zeros((nu_pad, D), jnp.bfloat16)
        utbl = utbl.at[:user_table.shape[0]].set(user_table.astype(jnp.bfloat16))
        itbl = jnp.zeros((ni_pad, D), jnp.bfloat16)
        itbl = itbl.at[:item_table.shape[0]].set(item_table.astype(jnp.bfloat16))
    else:
        # TODO(synk): in-kernel DMA gather (scalar-prefetch indices + pl.ANY
        # tables) for large tables; for now fall back to XLA gather from the
        # pre-cast bf16 tables (still saves the per-call cast + halves bytes).
        utbl = user_table.astype(jnp.bfloat16)
        itbl = item_table.astype(jnp.bfloat16)

    return dict(fused=fused, n_layers=n_layers, D=D, PAD=PAD,
                out_dim=widths[-1], utbl=utbl, itbl=itbl,
                w0u=w0u, w0i=w0i, wrest=wrest, b_pack=b_pack)


def mlp_forward(user_vector, item_vector, params, *, block_rows=1024,
                return_padded=False):
    """user_vector/item_vector: int [B].  Returns [B, out_dim] f32, or the raw
    lane-dense [B_pad, PAD] bf16 slab if return_padded=True (no slice pass)."""
    fused = params["fused"]
    n_layers = params["n_layers"]
    D = params["D"]
    PAD = params["PAD"]
    out_dim = params["out_dim"]
    B = user_vector.shape[0]

    # Batch tiling: TM rows per step (multiple of 16 for bf16 sublane packing).
    #  - avoids near-2x row padding for awkward B (TM tracks cdiv(B, n_steps)),
    #  - uses >= 2 grid steps for mid/large batches so ("parallel",) actually
    #    splits the batch across both v7x TensorCores.
    MIN_TM = 16
    n_steps = max(1, min(pl.cdiv(B, MIN_TM), max(2, pl.cdiv(B, block_rows))))
    TM = _round_up(pl.cdiv(B, n_steps), MIN_TM)
    B_pad = _round_up(B, TM)
    grid = (B_pad // TM,)

    w0_spec = pl.BlockSpec((D, PAD), lambda i: (0, 0))
    b_spec = pl.BlockSpec((n_layers, PAD), lambda i: (0, 0))
    out_spec = pl.BlockSpec((TM, PAD), lambda i: (i, 0))

    if fused:
        uidx = user_vector.astype(jnp.int32).reshape(B, 1)
        iidx = item_vector.astype(jnp.int32).reshape(B, 1)
        if B_pad != B:
            uidx = jnp.pad(uidx, ((0, B_pad - B), (0, 0)))
            iidx = jnp.pad(iidx, ((0, B_pad - B), (0, 0)))
        idx_spec = pl.BlockSpec((TM, 1), lambda i: (i, 0))
        utbl, itbl = params["utbl"], params["itbl"]
        args = [uidx, iidx, utbl, itbl, params["w0u"], params["w0i"]]
        in_specs = [idx_spec, idx_spec,
                    pl.BlockSpec(utbl.shape, lambda i: (0, 0)),
                    pl.BlockSpec(itbl.shape, lambda i: (0, 0)),
                    w0_spec, w0_spec]
    else:
        ue = jnp.take(params["utbl"], user_vector, axis=0)  # bf16 gather
        ie = jnp.take(params["itbl"], item_vector, axis=0)
        if B_pad != B:
            ue = jnp.pad(ue, ((0, B_pad - B), (0, 0)))
            ie = jnp.pad(ie, ((0, B_pad - B), (0, 0)))
        emb_spec = pl.BlockSpec((TM, D), lambda i: (i, 0))
        args = [ue, ie, params["w0u"], params["w0i"]]
        in_specs = [emb_spec, emb_spec, w0_spec, w0_spec]

    if n_layers > 1:
        args.append(params["wrest"])
        in_specs.append(pl.BlockSpec((n_layers - 1, PAD, PAD),
                                     lambda i: (0, 0, 0)))
    args.append(params["b_pack"])
    in_specs.append(b_spec)

    out = pl.pallas_call(
        _make_mlp_kernel(n_layers, fused),
        out_shape=jax.ShapeDtypeStruct((B_pad, PAD), jnp.bfloat16),
        grid=grid,
        in_specs=in_specs,
        out_specs=out_spec,
        compiler_params=pltpu.CompilerParams(
            dimension_semantics=("parallel",)),  # batch split over v7x's 2 TCs
    )(*args)

    if return_padded:
        return out  # lane-dense bf16 slab; caller slices [:B, :out_dim]
    return out[:B, :out_dim].astype(jnp.float32)


def init_params(key, n_users, n_items, latent_dim, n_mlp_layers):
    """Deterministic synthetic params matching the torch module's shapes."""
    keys = jax.random.split(key, 2 + 2 * n_mlp_layers)
    user_table = jax.random.normal(keys[0], (n_users, latent_dim), jnp.float32)
    item_table = jax.random.normal(keys[1], (n_items, latent_dim), jnp.float32)

    weights, biases = [], []
    units = latent_dim * 2
    for li in range(n_mlp_layers):
        in_f, out_f = units, units // 2
        bound = 1.0 / jnp.sqrt(in_f)
        # torch Linear weight is [out, in]; kept pre-transposed as [in, out].
        w = jax.random.uniform(keys[2 + 2 * li], (in_f, out_f),
                               jnp.float32, -bound, bound)
        b = jax.random.uniform(keys[3 + 2 * li], (out_f,),
                               jnp.float32, -bound, bound)
        weights.append(w)
        biases.append(b)
        units //= 2
    return user_table, item_table, weights, biases


def mlp_reference(user_vector, item_vector, user_table, item_table,
                  weights, biases, *, quantize_bf16=False):
    """Pure-JAX reference.  With quantize_bf16=True it mirrors the kernel's
    bf16-operand / f32-accumulate / bf16-activation numerics exactly."""
    ue = jnp.take(user_table, user_vector, axis=0)
    ie = jnp.take(item_table, item_vector, axis=0)
    x = jnp.concatenate([ue, ie], axis=1)
    for w, b in zip(weights, biases):
        if quantize_bf16:
            acc = jnp.dot(x.astype(jnp.bfloat16), w.astype(jnp.bfloat16),
                          preferred_element_type=jnp.float32)
            x = jnp.maximum(acc + b, 0.0)
            x = x.astype(jnp.bfloat16).astype(jnp.float32)  # bf16 activations
        else:
            x = jnp.maximum(x @ w + b, 0.0)
    return x


if __name__ == "__main__":
    n_users, n_items = 100, 200
    latent_dim = 32
    n_mlp_layers = 3
    batch = 8

    key = jax.random.PRNGKey(0)
    k_params, k_u, k_i = jax.random.split(key, 3)

    user_table, item_table, weights, biases = init_params(
        k_params, n_users, n_items, latent_dim, n_mlp_layers)

    user_vector = jax.random.randint(k_u, (batch,), 0, n_users, jnp.int32)
    item_vector = jax.random.randint(k_i, (batch,), 0, n_items, jnp.int32)

    # One-time parameter packing (hoisted out of the per-call path).
    packed = pack_params(user_table, item_table, weights, biases)
    packed = jax.tree_util.tree_map(
        lambda a: jax.block_until_ready(a) if isinstance(a, jax.Array) else a,
        packed)

    fwd = jax.jit(lambda uv, iv: mlp_forward(uv, iv, packed))
    out = jax.block_until_ready(fwd(user_vector, item_vector))

    ref_q = mlp_reference(user_vector, item_vector, user_table, item_table,
                          weights, biases, quantize_bf16=True)
    ref_f = mlp_reference(user_vector, item_vector, user_table, item_table,
                          weights, biases, quantize_bf16=False)

    assert out.shape == (batch, (latent_dim * 2) // (2 ** n_mlp_layers))
    # Tight check vs. a reference with identical bf16 quantization points.
    assert jnp.allclose(out, ref_q, atol=1e-3, rtol=1e-3)
    # Loose check vs. the exact f32 reference (bf16 matmul/activation precision).
    assert jnp.allclose(out, ref_f, atol=5e-2, rtol=5e-2)

    print("KERNEL_OK")
</pallas_src>

<mosaic_0001>
module attributes {stable_mosaic.version = 11 : i64} {
  func.func @kernel(%arg0: i32, %arg1: memref<16x1xi32, #tpu.memory_space<vmem>>, %arg2: memref<16x1xi32, #tpu.memory_space<vmem>>, %arg3: memref<128x32xbf16, #tpu.memory_space<vmem>>, %arg4: memref<256x32xbf16, #tpu.memory_space<vmem>>, %arg5: memref<32x128xbf16, #tpu.memory_space<vmem>>, %arg6: memref<32x128xbf16, #tpu.memory_space<vmem>>, %arg7: memref<2x128x128xbf16, #tpu.memory_space<vmem>>, %arg8: memref<3x128xf32, #tpu.memory_space<vmem>>, %arg9: memref<16x128xbf16, #tpu.memory_space<vmem>>) attributes {dimension_semantics = [#tpu.dimension_semantics<parallel>], iteration_bounds = array<i64: 1>, scalar_prefetch = 0 : i64, scratch_operands = 0 : i64, tpu.core_type = #tpu.core_type<tc>, window_params = [{transform_indices = @transform_0, window_bounds = array<i64: 16, 1>}, {transform_indices = @transform_1, window_bounds = array<i64: 16, 1>}, {pipeline_mode = #tpu.pipeline_mode<synchronous>, transform_indices = @transform_2, window_bounds = array<i64: 128, 32>}, {pipeline_mode = #tpu.pipeline_mode<synchronous>, transform_indices = @transform_3, window_bounds = array<i64: 256, 32>}, {pipeline_mode = #tpu.pipeline_mode<synchronous>, transform_indices = @transform_4, window_bounds = array<i64: 32, 128>}, {pipeline_mode = #tpu.pipeline_mode<synchronous>, transform_indices = @transform_5, window_bounds = array<i64: 32, 128>}, {pipeline_mode = #tpu.pipeline_mode<synchronous>, transform_indices = @transform_6, window_bounds = array<i64: 2, 128, 128>}, {pipeline_mode = #tpu.pipeline_mode<synchronous>, transform_indices = @transform_7, window_bounds = array<i64: 3, 128>}, {transform_indices = @transform_8, window_bounds = array<i64: 16, 128>}]} {
    %0 = tpu.iota {dimensions = array<i32: 1>} : vector<16x128xi32>
    %c0 = arith.constant 0 : index
    %c0_0 = arith.constant 0 : index
    %1 = vector.load %arg1[%c0, %c0_0] : memref<16x1xi32, #tpu.memory_space<vmem>>, vector<16x1xi32>
    %2 = vector.broadcast %1 : vector<16x1xi32> to vector<16x128xi32>
    %3 = arith.cmpi eq, %0, %2 : vector<16x128xi32>
    %4 = arith.extui %3 : vector<16x128xi1> to vector<16x128xi32>
    %5 = arith.sitofp %4 : vector<16x128xi32> to vector<16x128xf32>
    %6 = arith.truncf %5 : vector<16x128xf32> to vector<16x128xbf16>
    %7 = tpu.iota {dimensions = array<i32: 1>} : vector<16x256xi32>
    %c0_1 = arith.constant 0 : index
    %c0_2 = arith.constant 0 : index
    %8 = vector.load %arg2[%c0_1, %c0_2] : memref<16x1xi32, #tpu.memory_space<vmem>>, vector<16x1xi32>
    %9 = vector.broadcast %8 : vector<16x1xi32> to vector<16x256xi32>
    %10 = arith.cmpi eq, %7, %9 : vector<16x256xi32>
    %11 = arith.extui %10 : vector<16x256xi1> to vector<16x256xi32>
    %12 = arith.sitofp %11 : vector<16x256xi32> to vector<16x256xf32>
    %13 = arith.truncf %12 : vector<16x256xf32> to vector<16x256xbf16>
    %c0_3 = arith.constant 0 : index
    %c0_4 = arith.constant 0 : index
    %14 = vector.load %arg3[%c0_3, %c0_4] : memref<128x32xbf16, #tpu.memory_space<vmem>>, vector<128x32xbf16>
    %cst = arith.constant dense<0.000000e+00> : vector<16x32xf32>
    %15 = tpu.matmul %6, %14, %cst {dimension_numbers = #tpu.dot_dimension_numbers<[1], [0], [0], [1], [0, 0, 1, 1], [], []>} : vector<16x128xbf16>, vector<128x32xbf16>, vector<16x32xf32> -> vector<16x32xf32>
    %16 = arith.truncf %15 : vector<16x32xf32> to vector<16x32xbf16>
    %c0_5 = arith.constant 0 : index
    %c0_6 = arith.constant 0 : index
    %17 = vector.load %arg4[%c0_5, %c0_6] : memref<256x32xbf16, #tpu.memory_space<vmem>>, vector<256x32xbf16>
    %cst_7 = arith.constant dense<0.000000e+00> : vector<16x32xf32>
    %18 = tpu.matmul %13, %17, %cst_7 {dimension_numbers = #tpu.dot_dimension_numbers<[1], [0], [0], [1], [0, 0, 1, 1], [], []>} : vector<16x256xbf16>, vector<256x32xbf16>, vector<16x32xf32> -> vector<16x32xf32>
    %19 = arith.truncf %18 : vector<16x32xf32> to vector<16x32xbf16>
    %c0_8 = arith.constant 0 : index
    %c0_9 = arith.constant 0 : index
    %20 = vector.load %arg8[%c0_8, %c0_9] : memref<3x128xf32, #tpu.memory_space<vmem>>, vector<3x128xf32>
    %c0_10 = arith.constant 0 : index
    %c0_11 = arith.constant 0 : index
    %21 = vector.load %arg5[%c0_10, %c0_11] : memref<32x128xbf16, #tpu.memory_space<vmem>>, vector<32x128xbf16>
    %cst_12 = arith.constant dense<0.000000e+00> : vector<16x128xf32>
    %22 = tpu.matmul %16, %21, %cst_12 {dimension_numbers = #tpu.dot_dimension_numbers<[1], [0], [0], [1], [0, 0, 1, 1], [], []>} : vector<16x32xbf16>, vector<32x128xbf16>, vector<16x128xf32> -> vector<16x128xf32>
    %c0_13 = arith.constant 0 : index
    %c0_14 = arith.constant 0 : index
    %23 = vector.load %arg6[%c0_13, %c0_14] : memref<32x128xbf16, #tpu.memory_space<vmem>>, vector<32x128xbf16>
    %cst_15 = arith.constant dense<0.000000e+00> : vector<16x128xf32>
    %24 = tpu.matmul %19, %23, %cst_15 {dimension_numbers = #tpu.dot_dimension_numbers<[1], [0], [0], [1], [0, 0, 1, 1], [], []>} : vector<16x32xbf16>, vector<32x128xbf16>, vector<16x128xf32> -> vector<16x128xf32>
    %25 = arith.addf %22, %24 : vector<16x128xf32>
    %26 = vector.extract_strided_slice %20 {offsets = [0, 0], sizes = [1, 128], strides = [1, 1]} : vector<3x128xf32> to vector<1x128xf32>
    %27 = vector.broadcast %26 : vector<1x128xf32> to vector<16x128xf32>
    %28 = arith.addf %25, %27 : vector<16x128xf32>
    %cst_16 = arith.constant 0.000000e+00 : f32
    %29 = vector.broadcast %cst_16 : f32 to vector<16x128xf32>
    %30 = arith.maximumf %28, %29 : vector<16x128xf32>
    %31 = arith.truncf %30 : vector<16x128xf32> to vector<16x128xbf16>
    %c0_17 = arith.constant 0 : index
    %c0_18 = arith.constant 0 : index
    %c0_19 = arith.constant 0 : index
    %32 = vector.load %arg7[%c0_17, %c0_18, %c0_19] : memref<2x128x128xbf16, #tpu.memory_space<vmem>>, vector<1x128x128xbf16>
    %33 = vector.shape_cast %32 : vector<1x128x128xbf16> to vector<128x128xbf16>
    %cst_20 = arith.constant dense<0.000000e+00> : vector<16x128xf32>
    %34 = tpu.matmul %31, %33, %cst_20 {dimension_numbers = #tpu.dot_dimension_numbers<[1], [0], [0], [1], [0, 0, 1, 1], [], []>} : vector<16x128xbf16>, vector<128x128xbf16>, vector<16x128xf32> -> vector<16x128xf32>
    %35 = vector.extract_strided_slice %20 {offsets = [1, 0], sizes = [1, 128], strides = [1, 1]} : vector<3x128xf32> to vector<1x128xf32>
    %36 = vector.broadcast %35 : vector<1x128xf32> to vector<16x128xf32>
    %37 = arith.addf %34, %36 : vector<16x128xf32>
    %cst_21 = arith.constant 0.000000e+00 : f32
    %38 = vector.broadcast %cst_21 : f32 to vector<16x128xf32>
    %39 = arith.maximumf %37, %38 : vector<16x128xf32>
    %40 = arith.truncf %39 : vector<16x128xf32> to vector<16x128xbf16>
    %c1 = arith.constant 1 : index
    %c0_22 = arith.constant 0 : index
    %c0_23 = arith.constant 0 : index
    %41 = vector.load %arg7[%c1, %c0_22, %c0_23] : memref<2x128x128xbf16, #tpu.memory_space<vmem>>, vector<1x128x128xbf16>
    %42 = vector.shape_cast %41 : vector<1x128x128xbf16> to vector<128x128xbf16>
    %cst_24 = arith.constant dense<0.000000e+00> : vector<16x128xf32>
    %43 = tpu.matmul %40, %42, %cst_24 {dimension_numbers = #tpu.dot_dimension_numbers<[1], [0], [0], [1], [0, 0, 1, 1], [], []>} : vector<16x128xbf16>, vector<128x128xbf16>, vector<16x128xf32> -> vector<16x128xf32>
    %44 = vector.extract_strided_slice %20 {offsets = [2, 0], sizes = [1, 128], strides = [1, 1]} : vector<3x128xf32> to vector<1x128xf32>
    %45 = vector.broadcast %44 : vector<1x128xf32> to vector<16x128xf32>
    %46 = arith.addf %43, %45 : vector<16x128xf32>
    %cst_25 = arith.constant 0.000000e+00 : f32
    %47 = vector.broadcast %cst_25 : f32 to vector<16x128xf32>
    %48 = arith.maximumf %46, %47 : vector<16x128xf32>
    %49 = arith.truncf %48 : vector<16x128xf32> to vector<16x128xbf16>
    %c0_26 = arith.constant 0 : index
    %c0_27 = arith.constant 0 : index
    %50 = vector.load %arg9[%c0_26, %c0_27] : memref<16x128xbf16, #tpu.memory_space<vmem>>, vector<16x128xbf16>
    tpu.vector_store %arg9[%c0_26, %c0_27], %49 {strides = array<i32>} : memref<16x128xbf16, #tpu.memory_space<vmem>>, vector<16x128xbf16>,
    return
  }
  func.func @transform_0(%arg0: i32) -> (i32, i32) {
    %c0_i32 = arith.constant 0 : i32
    %c0_i32_0 = arith.constant 0 : i32
    return %arg0, %c0_i32 : i32, i32
  }
  func.func @transform_1(%arg0: i32) -> (i32, i32) {
    %c0_i32 = arith.constant 0 : i32
    %c0_i32_0 = arith.constant 0 : i32
    return %arg0, %c0_i32 : i32, i32
  }
  func.func @transform_2(%arg0: i32) -> (i32, i32) {
    %c0_i32 = arith.constant 0 : i32
    %c0_i32_0 = arith.constant 0 : i32
    %c0_i32_1 = arith.constant 0 : i32
    return %c0_i32, %c0_i32_0 : i32, i32
  }
  func.func @transform_3(%arg0: i32) -> (i32, i32) {
    %c0_i32 = arith.constant 0 : i32
    %c0_i32_0 = arith.constant 0 : i32
    %c0_i32_1 = arith.constant 0 : i32
    return %c0_i32, %c0_i32_0 : i32, i32
  }
  func.func @transform_4(%arg0: i32) -> (i32, i32) {
    %c0_i32 = arith.constant 0 : i32
    %c0_i32_0 = arith.constant 0 : i32
    %c0_i32_1 = arith.constant 0 : i32
    return %c0_i32, %c0_i32_0 : i32, i32
  }
  func.func @transform_5(%arg0: i32) -> (i32, i32) {
    %c0_i32 = arith.constant 0 : i32
    %c0_i32_0 = arith.constant 0 : i32
    %c0_i32_1 = arith.constant 0 : i32
    return %c0_i32, %c0_i32_0 : i32, i32
  }
  func.func @transform_6(%arg0: i32) -> (i32, i32, i32) {
    %c0_i32 = arith.constant 0 : i32
    %c0_i32_0 = arith.constant 0 : i32
    %c0_i32_1 = arith.constant 0 : i32
    %c0_i32_2 = arith.constant 0 : i32
    return %c0_i32, %c0_i32_0, %c0_i32_1 : i32, i32, i32
  }
  func.func @transform_7(%arg0: i32) -> (i32, i32) {
    %c0_i32 = arith.constant 0 : i32
    %c0_i32_0 = arith.constant 0 : i32
    %c0_i32_1 = arith.constant 0 : i32
    return %c0_i32, %c0_i32_0 : i32, i32
  }
  func.func @transform_8(%arg0: i32) -> (i32, i32) {
    %c0_i32 = arith.constant 0 : i32
    %c0_i32_0 = arith.constant 0 : i32
    return %arg0, %c0_i32 : i32, i32
  }
}

</mosaic_0001>

<bundles_post_ra>
// kernel: _lambda_.1
= control target key start
LH: loop header
LB: loop body
LE: loop exit
PB: predicated region body
PF: predicated region fallthrough
CT: control target
= control target key end

     0   :  { %13 = vsyncpa [#allocation3], 0  ;;  %s1226_s0 = inlined_call_operand.vmem [shape: s32[16,1], index: 0, kind: input, shape index: {}]   ;;  %s1227_s1 = inlined_call_operand.vmem [shape: s32[16,1], index: 1, kind: input, shape index: {}]   ;;  %s1228_s2 = inlined_call_operand.vmem [shape: bf16[128,32], index: 2, kind: input, shape index: {}]   ;;  %s1229_s3 = inlined_call_operand.hbm [shape: bf16[256,32], index: 3, kind: input, shape index: {}]   ;;  %s1230_s4 = inlined_call_operand.hbm [shape: bf16[32,128], index: 4, kind: input, shape index: {}]   ;;  %s1231_s5 = inlined_call_operand.vmem [shape: bf16[32,128], index: 5, kind: input, shape index: {}]   ;;  %s1232_s6 = inlined_call_operand.hbm [shape: bf16[2,128,128], index: 6, kind: input, shape index: {}]   ;;  %s1233_s7 = inlined_call_operand.vmem [shape: f32[3,128], index: 7, kind: input, shape index: {}]   ;;  %s1234_s8 = inlined_call_operand.vmem [shape: bf16[16,128], index: 8, kind: output, shape index: {}]  }
   0x1   :  { %14 = vsyncpa [#allocation5], 0  ;;  %s1075_s27 = smov [#allocation4]   ;;  %s1076_s29 = smov [#allocation2]  }
   0x2   :  { %s38_s28 = sshll.u32 %s1075_s27, 4  ;;  %s26_s30 = sshll.u32 %s1076_s29, 4  ;;  %s39_s28 = int_to_ptr.vmem [resolvable:$true] %s38_s28  ;;  %s27_s30 = int_to_ptr.vmem [resolvable:$true] %s26_s30 }
   0x3   :  { %s1019_s9 = scalar_lea.vmem %s39_s28, 256  ;;  %p1024_p1 = scmp.lt.s32.totalorder %s39_s28, %s39_s28 }
   0x4   :  { %p1020_p0 = scmp.ne.s32.totalorder %s39_s28, %s1019_s9  ;;  %p1025_p2 = scmp.lt.s32.totalorder %s1019_s9, %s1019_s9 }
   0x6   :  { %p1026_p3 = por %p1025_p2, %p1024_p1 }
   0x8   :  { %p1027_p4 = pnand %p1026_p3, %p1020_p0 }
   0xa   :  { %1030 = shalt.err (!%p1027_p4)
}
   0xb   :  { %s1077_s10 = smov 64   ;;  %s1078_s11 = smov 4  }
   0xc   :  { %44 = dma.hbm_to_vmem [thread:$0]  %s1230_s4, 256, %s39_s28, [#allocation5], %s1077_s10, %s1077_s10, %s1078_s11  }
   0xd   :  { %s1039_s14 = scalar_lea.vmem %s27_s30, 2048  ;;  %p1044_p6 = scmp.lt.s32.totalorder %s27_s30, %s27_s30 }
   0xe   :  { %p1040_p5 = scmp.ne.s32.totalorder %s27_s30, %s1039_s14  ;;  %p1045_p7 = scmp.lt.s32.totalorder %s1039_s14, %s1039_s14 }
  0x10   :  { %p1046_p8 = por %p1045_p7, %p1044_p6 }
  0x12   :  { %p1047_p9 = pnand %p1046_p8, %p1040_p5 }
  0x14   :  { %1050 = shalt.err (!%p1047_p9)
}
  0x15   :  { %32 = dma.hbm_to_vmem [thread:$0]  %s1229_s3, 2048, %s27_s30, [#allocation3], %s1077_s10, %s1077_s10, %s1078_s11  }
  0x16   :  { %s1079_s17 = smov [#allocation6]  }
  0x17   :  { %s52_s18 = sshll.u32 %s1079_s17, 4  ;;  %s53_s18 = int_to_ptr.vmem [resolvable:$true] %s52_s18 }
  0x18   :  { %s1059_s19 = scalar_lea.vmem %s53_s18, 2048  ;;  %p1064_p11 = scmp.lt.s32.totalorder %s53_s18, %s53_s18 }
  0x19   :  { %p1060_p10 = scmp.ne.s32.totalorder %s53_s18, %s1059_s19  ;;  %p1065_p12 = scmp.lt.s32.totalorder %s1059_s19, %s1059_s19 }
  0x1b   :  { %p1066_p13 = por %p1065_p12, %p1064_p11 }
  0x1d   :  { %p1067_p0 = pnand %p1066_p13, %p1060_p10 }
  0x1f   :  { %1070 = shalt.err (!%p1067_p0)
}
  0x20   :  { %58 = dma.hbm_to_vmem [thread:$0]  %s1232_s6, 2048, %s53_s18, [#allocation5], %s1077_s10, %s1077_s10, %s1078_s11  }
  0x21   :  { %1071 = dma.done.wait [#allocation3], 2048  }
  0x22   :  { %1072 = vsyncadd [#allocation3], 4294965248 }
  0x23   :  { %1073 = dma.done.wait [#allocation5], 2304  }
  0x24   :  { %1074 = vsyncadd [#allocation5], 4294964992  ;;  %v1080_v0 = vmov 0   ;;  %v1081_v1 = vmov 0.0   ;;  %v89_v2 = vld [vmem:[%s1227_s1] sm:$0xff]  ;;  %v90_v4 = vld [vmem:[%s1227_s1 + $0x8] sm:$0xff]  ;;  %v71_v30 = vlaneseq }
  0x25   :  { %966 = vset.pattern.permute.xlu1 %v1080_v0  ;;  %965 = vset.pattern.permute.xlu0 %v1080_v0  ;;  %v73_v3 = vld [vmem:[%s1226_s0] sm:$0xff]  ;;  %v74_v5 = vld [vmem:[%s1226_s0 + $0x8] sm:$0xff]  ;;  %v967_v6 = vld [vmem:[%s1228_s2 + $0x38] sm:$0xff]   ;;  %vm1082_vm0 = vmmov 0   ;;  %v1083_v37 = vmov 1.0|1.0  }
  0x26   :  { %880 = vmatprep.subr.bf16.mxu0 %v1081_v1  ;;  %92 = vperm.xlu0 %965, %v89_v2   ;;  %v968_v7 = vld [vmem:[#allocation2 + $0x78] sm:$0xff]   ;;  %v970_v9 = vld [vmem:[%s1228_s2 + $0x30] sm:$0xff]   ;;  %v973_v12 = vld [vmem:[%s1228_s2 + $0x28] sm:$0xff]   ;;  %v72_v31 = vand.u32 127, %v71_v30  ;;  %vm408_vm10 = vcmask 261120  }
  0x27   :  { %76 = vperm.xlu1 %966, %v73_v3   ;;  %896 = vmatprep.mubr.msk.bf16.mxu0 %vm1082_vm0, %v1081_v1  ;;  %v969_v8 = vld [vmem:[#allocation2 + $0x38] sm:$0xff]   ;;  %v971_v10 = vld [vmem:[#allocation2 + $0x70] sm:$0xff]   ;;  %v974_v13 = vld [vmem:[#allocation2 + $0x68] sm:$0xff]  }
  0x28   :  { %881 = vmatpush3.bf16.msra.mxu0 %v967_v6  ;;  %834 = vmatprep.subr.bf16.mxu1 %v968_v7  ;;  %v972_v11 = vld [vmem:[#allocation2 + $0x30] sm:$0xff]   ;;  %v975_v14 = vld [vmem:[#allocation2 + $0x28] sm:$0xff]   ;;  %v976_v15 = vld [vmem:[%s1228_s2 + $0x20] sm:$0xff]   ;;  %v88_v34 = vadd.s32 128, %v72_v31 }
  0x29   :  { %882 = vmatprep.subr.bf16.mxu0 %v1081_v1  ;;  %835 = vmatpush3.bf16.msra.mxu1 %v969_v8  ;;  %v977_v16 = vld [vmem:[#allocation2 + $0x60] sm:$0xff]   ;;  %v979_v18 = vld [vmem:[%s1228_s2 + $0x18] sm:$0xff]   ;;  %v982_v21 = vld [vmem:[%s1228_s2 + $0x10] sm:$0xff]  }
  0x2a   :  { %95 = vperm.xlu0 %965, %v90_v4   ;;  %836 = vmatprep.subr.bf16.mxu1 %v971_v10  ;;  %v978_v17 = vld [vmem:[#allocation2 + $0x20] sm:$0xff]   ;;  %v980_v19 = vld [vmem:[#allocation2 + $0x58] sm:$0xff]   ;;  %v983_v22 = vld [vmem:[#allocation2 + $0x50] sm:$0xff]   ;;  %v510_v4 = vshrl.u32 %v71_v30, 7 }
  0x2b   :  { %79 = vperm.xlu1 %966, %v74_v5   ;;  %v981_v20 = vld [vmem:[#allocation2 + $0x18] sm:$0xff]   ;;  %v984_v23 = vld [vmem:[#allocation2 + $0x10] sm:$0xff]   ;;  %v985_v24 = vld [vmem:[%s1228_s2 + $0x8] sm:$0xff]  }
  0x2c   :  { %883 = vmatpush3.bf16.msra.mxu0 %v970_v9  ;;  %v986_v25 = vld [vmem:[#allocation2 + $0x48] sm:$0xff]   ;;  %v988_v27 = vld [vmem:[%s1228_s2] sm:$0xff]   ;;  %v997_v56 = vld [vmem:[#allocation6 + $0x28] sm:$0xff]   ;;  %v511_v7 = vsub.s32 0, %v510_v4 }
  0x2d   :  { %884 = vmatprep.subr.bf16.mxu0 %v1081_v1  ;;  %837 = vmatpush3.bf16.msra.mxu1 %v972_v11  ;;  %v987_v26 = vld [vmem:[#allocation2 + $0x8] sm:$0xff]   ;;  %v989_v28 = vld [vmem:[#allocation2 + $0x40] sm:$0xff]   ;;  %v998_v57 = vld [vmem:[#allocation6 + $0x20] sm:$0xff]  }
  0x2e   :  { %838 = vmatprep.subr.bf16.mxu1 %v974_v13  ;;  %v990_v29 = vld [vmem:[#allocation2] sm:$0xff]   ;;  %v991_v38 = vld [vmem:[#allocation4 + $0x8] sm:$0xff]   ;;  %v1001_v60 = vld [vmem:[#allocation6 + $0x8] sm:$0xff]  }
  0x2f   :  { %v993_v39 = vld [vmem:[#allocation4] sm:$0xff]   ;;  %v992_v40 = vld [vmem:[%s1231_s5 + $0x8] sm:$0xff]   ;;  %v1002_v61 = vld [vmem:[#allocation6] sm:$0xff]  }
  0x30   :  { %885 = vmatpush3.bf16.msra.mxu0 %v973_v12  ;;  %v994_v41 = vld [vmem:[%s1231_s5] sm:$0xff]   ;;  %v995_v53 = vld [vmem:[#allocation6 + $0x38] sm:$0xff]   ;;  %v1005_v0 = vld [vmem:[#allocation6 + $0x68] sm:$0xff]  }
  0x31   :  { %886 = vmatprep.subr.bf16.mxu0 %v1081_v1  ;;  %839 = vmatpush3.bf16.msra.mxu1 %v975_v14  ;;  %v996_v55 = vld [vmem:[#allocation6 + $0x30] sm:$0xff]   ;;  %v999_v58 = vld [vmem:[#allocation6 + $0x18] sm:$0xff]   ;;  %v1006_v2 = vld [vmem:[#allocation6 + $0x60] sm:$0xff]  }
  0x32   :  { %840 = vmatprep.subr.bf16.mxu1 %v977_v16  ;;  %v1000_v59 = vld [vmem:[#allocation6 + $0x10] sm:$0xff]   ;;  %v1003_v62 = vld [vmem:[#allocation6 + $0x78] sm:$0xff]  }
  0x33   :  { %v1004_v63 = vld [vmem:[#allocation6 + $0x70] sm:$0xff]   ;;  %v1007_v3 = vld [vmem:[#allocation6 + $0x58] sm:$0xff]  }
  0x34   :  { %887 = vmatpush3.bf16.msra.mxu0 %v976_v15  ;;  %v387_v9 = vld [vmem:[%s1233_s7] sm:$0x7] }
  0x35   :  { %888 = vmatprep.subr.bf16.mxu0 %v1081_v1  ;;  %841 = vmatpush3.bf16.msra.mxu1 %v978_v17  ;;  %v512_v13 = vrot.slane %v387_v9, %v511_v7 }
  0x36   :  { %842 = vmatprep.subr.bf16.mxu1 %v980_v19 }
  0x38   :  { %889 = vmatpush3.bf16.msra.mxu0 %v979_v18 }
  0x39   :  { %890 = vmatprep.subr.bf16.mxu0 %v1081_v1  ;;  %843 = vmatpush3.bf16.msra.mxu1 %v981_v20 }
  0x3a   :  { %844 = vmatprep.subr.bf16.mxu1 %v983_v22 }
  0x3c   :  { %891 = vmatpush3.bf16.msra.mxu0 %v982_v21 }
  0x3d   :  { %892 = vmatprep.subr.bf16.mxu0 %v1081_v1  ;;  %845 = vmatpush3.bf16.msra.mxu1 %v984_v23  ;;  %v1008_v23 = vld [vmem:[#allocation6 + $0x50] sm:$0xff]  }
  0x3e   :  { %846 = vmatprep.subr.bf16.mxu1 %v986_v25  ;;  %v1010_v25 = vld [vmem:[#allocation6 + $0x40] sm:$0xff]  }
  0x40   :  { %893 = vmatpush3.bf16.msra.mxu0 %v985_v24  ;;  %v1009_v24 = vld [vmem:[#allocation6 + $0x48] sm:$0xff]  }
  0x41   :  { %894 = vmatprep.subr.bf16.mxu0 %v1081_v1  ;;  %847 = vmatpush3.bf16.msra.mxu1 %v987_v26  ;;  %v536_v26 = vsub.s32 1, %v510_v4 }
  0x42   :  { %848 = vmatprep.subr.bf16.mxu1 %v989_v28 }
  0x44   :  { %895 = vmatpush3.bf16.msra.mxu0 %v988_v27  ;;  %v537_v27 = vrot.slane %v387_v9, %v536_v26 }
  0x45   :  { %900 = vmatprep.subr.bf16.mxu0 %v1081_v1  ;;  %849 = vmatpush3.bf16.msra.mxu1 %v990_v29 }
  0x46   :  { %908 = vmatprep.subr.bf16.mxu1 %v1081_v1 }
  0xa1   :  { %v93_v32 = vpop.permute.xlu0 %92 }
  0xa2   :  { %v77_v33 = vpop.permute.xlu1 %76  ;;  %vm97_vm2 = vcmp.eq.s32.totalorder %v72_v31, %v93_v32  ;;  %vm98_vm8 = vcmp.eq.s32.totalorder %v88_v34, %v93_v32 }
  0xa3   :  { %vm81_vm1 = vcmp.eq.s32.totalorder %v72_v31, %v77_v33 }
  0xa5   :  { %v96_v35 = vpop.permute.xlu0 %95 }
  0xa6   :  { %v80_v36 = vpop.permute.xlu1 %79  ;;  %vm99_vm3 = vcmp.eq.s32.totalorder %v72_v31, %v96_v35  ;;  %vm100_vm4 = vcmp.eq.s32.totalorder %v88_v34, %v96_v35 }
  0xa7   :  { %vm82_vm5 = vcmp.eq.s32.totalorder %v72_v31, %v80_v36  ;;  %vm792_vm6 = vmpackc.low %vm99_vm3, %vm97_vm2 }
  0xa8   :  { %vm772_vm7 = vmpackc.low %vm82_vm5, %vm81_vm1 }
  0xa9   :  { %897 = vmatmul.mubr.msk.bf16.vlgmr.msra.gmra.mxu0 %vm772_vm7, %v1083_v37  ;;  %vm790_vm9 = vmpackc.low %vm100_vm4, %vm98_vm8 }
  0xaa   :  { %791 = vmatprep.mubr.msk.bf16.mxu1 %vm790_vm9, %v1083_v37  ;;  %904 = vmatprep.mubr.msk.bf16.mxu0 %vm1082_vm0, %v1081_v1 }
  0xab   :  { %793 = vmatmul.mubr.msk.bf16.vlgmr.msra.gmra.mxu1 %vm792_vm6, %v1083_v37  ;;  %901 = vmatpush3.bf16.msra.mxu0 %v992_v40  ;;  %v649_v37 = vsub.s32 2, %v510_v4 }
  0xac   :  { %912 = vmatprep.mubr.msk.bf16.mxu1 %vm1082_vm0, %v1081_v1  ;;  %909 = vmatpush3.bf16.msra.mxu1 %v991_v38 }
  0xad   :  { %910 = vmatprep.subr.bf16.mxu1 %v1081_v1  ;;  %902 = vmatprep.subr.bf16.mxu0 %v1081_v1  ;;  %v650_v38 = vrot.slane %v387_v9, %v649_v37 }
  0xaf   :  { %903 = vmatpush3.bf16.msra.mxu0 %v994_v41 }
  0xb0   :  { %911 = vmatpush3.bf16.msra.mxu1 %v993_v39  ;;  %916 = vmatprep.subr.bf16.mxu0 %v1081_v1 }
  0xb1   :  { %936 = vmatprep.subr.bf16.mxu1 %v1081_v1 }
 0x169   :  { %v209_v42 = vpop.f32.mrf.mxu0 }
 0x16b   :  { %v850_v43 = vpop.f32.mrf.mxu1  ;;  %v898_v44 = vpop.f32.mrf.mxu0 }
 0x16d   :  { %v851_v45 = vpop.f32.mrf.mxu1  ;;  %v212_v46 = vpop.f32.mrf.mxu0 }
 0x16e   :  { %v216_v47 = vpack.c.bf16 %v212_v46, %v209_v42  ;;  %v852_v51 = vadd.f32 %v851_v45, %v850_v43 }
 0x16f   :  { %v853_v48 = vpop.f32.mrf.mxu1  ;;  %v899_v49 = vpop.f32.mrf.mxu0 }
 0x170   :  { %913 = vmatmul.mubr.msk.bf16.vlgmr.msra.gmra.mxu1 %vm408_vm10, %v216_v47 }
 0x171   :  { %v854_v50 = vpop.f32.mrf.mxu1  ;;  %952 = vmatprep.mubr.msk.bf16.mxu1 %vm1082_vm0, %v1081_v1  ;;  %937 = vmatpush3.bf16.msra.mxu1 %v1003_v62 }
 0x172   :  { %v855_v52 = vadd.f32 %v854_v50, %v853_v48  ;;  %938 = vmatprep.subr.bf16.mxu1 %v1081_v1 }
 0x174   :  { %v386_v54 = vpack.c.bf16 %v855_v52, %v852_v51 }
 0x175   :  { %939 = vmatpush3.bf16.msra.mxu1 %v1004_v63 }
 0x176   :  { %905 = vmatmul.mubr.msk.bf16.vlgmr.msra.gmra.mxu0 %vm408_vm10, %v386_v54  ;;  %940 = vmatprep.subr.bf16.mxu1 %v1081_v1 }
 0x177   :  { %917 = vmatpush3.bf16.msra.mxu0 %v995_v53  ;;  %932 = vmatprep.mubr.msk.bf16.mxu0 %vm1082_vm0, %v1081_v1 }
 0x178   :  { %918 = vmatprep.subr.bf16.mxu0 %v1081_v1 }
 0x179   :  { %941 = vmatpush3.bf16.msra.mxu1 %v1005_v0 }
 0x17a   :  { %942 = vmatprep.subr.bf16.mxu1 %v1081_v1 }
 0x17b   :  { %919 = vmatpush3.bf16.msra.mxu0 %v996_v55 }
 0x17c   :  { %920 = vmatprep.subr.bf16.mxu0 %v1081_v1 }
 0x17d   :  { %943 = vmatpush3.bf16.msra.mxu1 %v1006_v2 }
 0x17e   :  { %944 = vmatprep.subr.bf16.mxu1 %v1081_v1 }
 0x17f   :  { %921 = vmatpush3.bf16.msra.mxu0 %v997_v56 }
 0x180   :  { %922 = vmatprep.subr.bf16.mxu0 %v1081_v1 }
 0x181   :  { %945 = vmatpush3.bf16.msra.mxu1 %v1007_v3 }
 0x182   :  { %946 = vmatprep.subr.bf16.mxu1 %v1081_v1 }
 0x183   :  { %923 = vmatpush3.bf16.msra.mxu0 %v998_v57 }
 0x184   :  { %924 = vmatprep.subr.bf16.mxu0 %v1081_v1 }
 0x185   :  { %947 = vmatpush3.bf16.msra.mxu1 %v1008_v23 }
 0x186   :  { %948 = vmatprep.subr.bf16.mxu1 %v1081_v1 }
 0x187   :  { %925 = vmatpush3.bf16.msra.mxu0 %v999_v58 }
 0x188   :  { %926 = vmatprep.subr.bf16.mxu0 %v1081_v1 }
 0x189   :  { %949 = vmatpush3.bf16.msra.mxu1 %v1009_v24 }
 0x18a   :  { %950 = vmatprep.subr.bf16.mxu1 %v1081_v1 }
 0x18b   :  { %927 = vmatpush3.bf16.msra.mxu0 %v1000_v59 }
 0x18c   :  { %928 = vmatprep.subr.bf16.mxu0 %v1081_v1 }
 0x18d   :  { %951 = vmatpush3.bf16.msra.mxu1 %v1010_v25 }
 0x18f   :  { %929 = vmatpush3.bf16.msra.mxu0 %v1001_v60 }
 0x190   :  { %930 = vmatprep.subr.bf16.mxu0 %v1081_v1 }
 0x193   :  { %931 = vmatpush3.bf16.msra.mxu0 %v1002_v61 }
 0x230   :  { %v502_v5 = vpop.f32.mrf.mxu1 }
 0x232   :  { %v914_v6 = vpop.f32.mrf.mxu1 }
 0x234   :  { %v505_v8 = vpop.f32.mrf.mxu1 }
 0x236   :  { %v446_v10 = vpop.f32.mrf.mxu0  ;;  %v915_v11 = vpop.f32.mrf.mxu1 }
 0x237   :  { %v503_v12 = vadd.f32 %v502_v5, %v446_v10 }
 0x238   :  { %v906_v14 = vpop.f32.mrf.mxu0 }
 0x239   :  { %v513_v16 = vadd.f32 %v512_v13, %v503_v12 }
 0x23a   :  { %v449_v15 = vpop.f32.mrf.mxu0 }
 0x23b   :  { %v506_v17 = vadd.f32 %v505_v8, %v449_v15  ;;  %v515_v20 = vmax.f32 %v513_v16, 0.0 }
 0x23c   :  { %v907_v18 = vpop.f32.mrf.mxu0 }
 0x23d   :  { %v514_v19 = vadd.f32 %v512_v13, %v506_v17 }
 0x23f   :  { %v516_v21 = vmax.f32 %v514_v19, 0.0 }
 0x241   :  { %v517_v22 = vpack.c.bf16 %v516_v21, %v515_v20 }
 0x243   :  { %933 = vmatmul.mubr.bf16.vlgmr.msra.gmra.mxu0 %v517_v22 }
 0x303   :  { %v620_v28 = vpop.f32.mrf.mxu0 }
 0x304   :  { %v621_v30 = vadd.f32 %v620_v28, %v537_v27 }
 0x305   :  { %v934_v29 = vpop.f32.mrf.mxu0 }
 0x306   :  { %v627_v34 = vmax.f32 %v621_v30, 0.0 }
 0x307   :  { %v623_v31 = vpop.f32.mrf.mxu0 }
 0x308   :  { %v624_v32 = vadd.f32 %v623_v31, %v537_v27 }
 0x309   :  { %v935_v33 = vpop.f32.mrf.mxu0 }
 0x30a   :  { %v628_v35 = vmax.f32 %v624_v32, 0.0 }
 0x30c   :  { %v629_v36 = vpack.c.bf16 %v628_v35, %v627_v34 }
 0x30e   :  { %953 = vmatmul.mubr.bf16.vlgmr.msra.gmra.mxu1 %v629_v36 }
 0x3ce   :  { %v733_v39 = vpop.f32.mrf.mxu1 }
 0x3cf   :  { %v734_v41 = vadd.f32 %v733_v39, %v650_v38 }
 0x3d0   :  { %v954_v40 = vpop.f32.mrf.mxu1 }
 0x3d1   :  { %v740_v44 = vmax.f32 %v734_v41, 0.0 }
 0x3d2   :  { %v736_v1 = vpop.f32.mrf.mxu1 }
 0x3d3   :  { %v737_v42 = vadd.f32 %v736_v1, %v650_v38 }
 0x3d4   :  { %v955_v43 = vpop.f32.mrf.mxu1 }
 0x3d5   :  { %v741_v45 = vmax.f32 %v737_v42, 0.0 }
 0x3d7   :  { %v823_v46 = vpack.c.bf16 %v741_v45, %v740_v44 }
 0x3d9   :  { %824 = vst [vmem:[%s1234_s8] sm:$0xff] %v823_v46  }
 0x3da   :  { %756 = vsyncpa [#allocation3], 1 }
 0x3db   :  { %757 = vsyncpa [#allocation5], 1 }

</bundles_post_ra>
